<compile_context>
chip_gen: v7x
topology: tpu7x:2x2x1
jax: 0.10.0
libtpu: 0.0.40
codegen_flags: <defaults>
</compile_context>

<pallas_src>
import math
import functools

import jax
import jax.numpy as jnp
from jax import lax
from jax.experimental import pallas as pl
from jax.experimental.pallas import tpu as pltpu


_SUB = 8  # sublane rows per inner sub-slab: one (8,128) f32 vreg per value


# ---- complex helpers on (re, im) pairs; im may be None meaning exactly 0 ----
def _conj(a):
    return (a[0], None if a[1] is None else -a[1])


def _neg(a):
    return (-a[0], None if a[1] is None else -a[1])


def _cscale(c, a):  # python float * complex
    return (c * a[0], None if a[1] is None else c * a[1])


def _rmul(r, a):  # real array * complex
    return (r * a[0], None if a[1] is None else r * a[1])


def _cmul(a, b):
    ar, ai = a
    br, bi = b
    if ai is None and bi is None:
        return (ar * br, None)
    if ai is None:
        return (ar * br, ar * bi)
    if bi is None:
        return (ar * br, ai * br)
    return (ar * br - ai * bi, ar * bi + ai * br)


def _cadd(*terms):
    re = terms[0][0]
    im = terms[0][1]
    for t in terms[1:]:
        re = re + t[0]
        ti = t[1]
        if ti is not None:
            im = ti if im is None else im + ti
    return (re, im)


def _make_sh_kernel(lmax: int, normalize: bool, rows_block: int):
    """Build a Pallas kernel computing complex spherical harmonics up to lmax."""
    C = math.sqrt(4.0 * math.pi)  # global scale folded into every constant
    c00 = 0.5 * math.sqrt(1.0 / math.pi) * C
    c1m = 0.5 * math.sqrt(3.0 / (2.0 * math.pi)) * C
    c10 = 0.5 * math.sqrt(3.0 / math.pi) * C
    c2m2 = 0.25 * math.sqrt(15.0 / (2.0 * math.pi)) * C
    c2m1 = 0.5 * math.sqrt(15.0 / (2.0 * math.pi)) * C
    c20 = 0.25 * math.sqrt(5.0 / math.pi) * C
    c3m3 = 0.125 * math.sqrt(35.0 / math.pi) * C
    c3m2 = 0.25 * math.sqrt(105.0 / (2.0 * math.pi)) * C
    c3m1 = 0.125 * math.sqrt(21.0 / math.pi) * C
    c30 = 0.25 * math.sqrt(7.0 / math.pi) * C

    n_sub = rows_block // _SUB

    def kernel(x_ref, or_ref, oi_ref):
        # Hoisted broadcast constants (JAX does not CSE broadcast_in_dim).
        c00_tile = jnp.full((_SUB, 128), c00, dtype=jnp.float32)
        zero_tile = jnp.zeros((_SUB, 128), dtype=jnp.float32)

        # Static python loop over (8,128) sub-slabs: per-iteration live set is
        # a few tens of vregs, and all indices are static slices.
        for s in range(n_sub):
            sl = slice(s * _SUB, (s + 1) * _SUB)
            x = x_ref[0, sl, :]
            y = x_ref[1, sl, :]
            z = x_ref[2, sl, :]

            if normalize:
                # torch F.normalize: x / max(||x||,1e-12) == x*rsqrt(max(||x||^2,1e-24))
                # Padded zero points stay exactly zero (finite outputs).
                r2 = x * x + y * y + z * z
                inv = lax.rsqrt(jnp.maximum(r2, 1e-24))
                x = x * inv
                y = y * inv
                z = z * inv

            def put(m, val, _sl=sl):
                re, im = val
                or_ref[m, _sl, :] = re
                oi_ref[m, _sl, :] = zero_tile if im is None else im

            # l = 0
            put(0, (c00_tile, None))

            if lmax >= 1:
                xmiy = (x, -y)                         # x - i*y
                put(1, _cscale(c1m, xmiy))
                put(2, (c10 * z, None))
                put(3, (-c1m * x, -c1m * y))           # -c1m * (x + i*y)

            if lmax >= 2:
                xmiy2 = _cmul(xmiy, xmiy)
                xmiy_z = _rmul(z, xmiy)
                z2 = z * z
                put(4, _cscale(c2m2, xmiy2))
                put(5, _cscale(c2m1, xmiy_z))
                put(6, (c20 * (3.0 * z2 - 1.0), None))
                put(7, _cscale(-c2m1, _conj(xmiy_z)))
                put(8, _cscale(c2m2, _conj(xmiy2)))

            if lmax >= 3:
                xmiy3 = _cmul(xmiy2, xmiy)
                fz = 5.0 * z2 - 1.0
                sh_3_0 = _cscale(c3m3, xmiy3)
                sh_3_1 = _cscale(c3m2, _rmul(z, xmiy2))
                sh_3_2 = _cscale(c3m1, _rmul(fz, xmiy))
                sh_3_3 = (c30 * (5.0 * z2 * z - 3.0 * z), None)
                sh_3_4 = _neg(_conj(sh_3_2))
                sh_3_5 = _conj(sh_3_1)
                sh_3_6 = _neg(_conj(sh_3_0))
                for k, v in enumerate((sh_3_0, sh_3_1, sh_3_2, sh_3_3,
                                       sh_3_4, sh_3_5, sh_3_6)):
                    put(9 + k, v)

            if lmax >= 4:
                sh_4_0 = _cadd(_cscale(0.935414346693485, _rmul(z, sh_3_0)),
                               _cscale(0.935414346693485, _rmul(x, sh_3_6)))
                sh_4_1 = _cadd(_cscale(0.661437827766148, _rmul(y, sh_3_0)),
                               _cscale(0.810092587300982, _rmul(z, sh_3_1)),
                               _cscale(0.810092587300983, _rmul(x, sh_3_5)))
                sh_4_2 = _cadd(_cscale(-0.176776695296637, _rmul(z, sh_3_0)),
                               _cscale(0.866025403784439, _rmul(y, sh_3_1)),
                               _cscale(0.684653196881458, _rmul(z, sh_3_2)),
                               _cscale(0.684653196881457, _rmul(x, sh_3_4)),
                               _cscale(0.176776695296637, _rmul(x, sh_3_6)))
                sh_4_3 = _cadd(_cscale(-0.306186217847897, _rmul(z, sh_3_1)),
                               _cscale(0.968245836551855, _rmul(y, sh_3_2)),
                               _cscale(0.790569415042095, _rmul(x, sh_3_3)),
                               _cscale(0.306186217847897, _rmul(x, sh_3_5)))
                sh_4_4 = _cadd(_cscale(-0.612372435695795, _rmul(x, sh_3_2)),
                               _rmul(y, sh_3_3),
                               _cscale(-0.612372435695795, _rmul(z, sh_3_4)))
                sh_4_5 = _cadd(_cscale(-0.306186217847897, _rmul(x, sh_3_1)),
                               _cscale(0.790569415042096, _rmul(z, sh_3_3)),
                               _cscale(0.968245836551854, _rmul(y, sh_3_4)),
                               _cscale(-0.306186217847897, _rmul(z, sh_3_5)))
                sh_4_6 = _cadd(_cscale(-0.176776695296637, _rmul(x, sh_3_0)),
                               _cscale(-0.684653196881457, _rmul(x, sh_3_2)),
                               _cscale(0.684653196881457, _rmul(z, sh_3_4)),
                               _cscale(0.866025403784439, _rmul(y, sh_3_5)),
                               _cscale(-0.176776695296637, _rmul(z, sh_3_6)))
                sh_4_7 = _cadd(_cscale(-0.810092587300982, _rmul(x, sh_3_1)),
                               _cscale(0.810092587300982, _rmul(z, sh_3_5)),
                               _cscale(0.661437827766148, _rmul(y, sh_3_6)))
                sh_4_8 = _cadd(_cscale(-0.935414346693485, _rmul(x, sh_3_0)),
                               _cscale(0.935414346693486, _rmul(z, sh_3_6)))
                for k, v in enumerate((sh_4_0, sh_4_1, sh_4_2, sh_4_3, sh_4_4,
                                       sh_4_5, sh_4_6, sh_4_7, sh_4_8)):
                    put(16 + k, v)

    return kernel


@functools.partial(jax.jit, static_argnames=("lmax", "normalize"))
def spherical_harmonics(x: jax.Array, lmax: int = 3, normalize: bool = True) -> jax.Array:
    """Equivalent of MACE `sphericalharmonics(lmax, normalize).forward(x)`.

    x: float array of shape [..., 3]
    returns: complex64 array of shape [..., (lmax+1)**2]
    """
    assert x.shape[-1] == 3
    assert 0 <= lmax <= 4
    nsh = (lmax + 1) ** 2

    lead_shape = x.shape[:-1]
    xf = x.reshape(-1, 3).astype(jnp.float32)
    n = xf.shape[0]

    # Lane-dense layout: point index on the (sublane, lane) axes.
    rows_total = -(-n // 128)
    rows_block = min(64, -(-rows_total // _SUB) * _SUB)     # multiple of 8, <= 64
    rows_padded = -(-rows_total // rows_block) * rows_block
    n_pad = rows_padded * 128

    if n_pad != n:
        # Padded points are zero vectors; they stay zero through the rsqrt
        # normalization, give finite SH values and are sliced off below.
        xf = jnp.pad(xf, ((0, n_pad - n), (0, 0)))
    xt = xf.T.reshape(3, rows_padded, 128)

    kernel = _make_sh_kernel(lmax, normalize, rows_block)

    out_re, out_im = pl.pallas_call(
        kernel,
        out_shape=(
            jax.ShapeDtypeStruct((nsh, rows_padded, 128), jnp.float32),
            jax.ShapeDtypeStruct((nsh, rows_padded, 128), jnp.float32),
        ),
        grid_spec=pltpu.PrefetchScalarGridSpec(
            num_scalar_prefetch=0,
            grid=(rows_padded // rows_block,),
            in_specs=[pl.BlockSpec((3, rows_block, 128), lambda i: (0, i, 0))],
            out_specs=[
                pl.BlockSpec((nsh, rows_block, 128), lambda i: (0, i, 0)),
                pl.BlockSpec((nsh, rows_block, 128), lambda i: (0, i, 0)),
            ],
        ),
        compiler_params=pltpu.CompilerParams(
            dimension_semantics=("parallel",)),
    )(xt)

    # (NSH, n_pad) -> (n, NSH) complex64.  Pallas VMEM has no complex dtype,
    # so the combine + transpose stays in the (fused) XLA epilogue.
    re = out_re.reshape(nsh, n_pad)[:, :n].T
    im = out_im.reshape(nsh, n_pad)[:, :n].T
    out = lax.complex(re, im)
    return out.reshape(lead_shape + (nsh,))


def _reference(x, lmax, normalize):
    """Plain-JAX reference mirroring the torch module, for validation (lmax<=4)."""
    x = x.astype(jnp.float32)
    if normalize:
        nrm = jnp.sqrt(jnp.sum(x * x, axis=-1, keepdims=True))
        x = x / jnp.maximum(nrm, 1e-12)
    xr, yr, zr = x[..., 0], x[..., 1], x[..., 2]
    zero = jnp.zeros_like(xr)
    out = [lax.complex(0.5 * math.sqrt(1.0 / math.pi) * jnp.ones_like(xr), zero)]
    if lmax >= 1:
        xmiy = lax.complex(xr, -yr)
        xpiy = lax.complex(xr, yr)
        z = lax.complex(zr, zero)
        out += [0.5 * math.sqrt(3 / (2 * math.pi)) * xmiy,
                0.5 * math.sqrt(3 / math.pi) * z,
                -0.5 * math.sqrt(3 / (2 * math.pi)) * xpiy]
    if lmax >= 2:
        xmiy2, xpiy2, z2 = xmiy * xmiy, xpiy * xpiy, z * z
        out += [0.25 * math.sqrt(15 / (2 * math.pi)) * xmiy2,
                0.5 * math.sqrt(15 / (2 * math.pi)) * xmiy * z,
                0.25 * math.sqrt(5 / math.pi) * (3 * z2 - 1),
                -0.5 * math.sqrt(15 / (2 * math.pi)) * xpiy * z,
                0.25 * math.sqrt(15 / (2 * math.pi)) * xpiy2]
    if lmax >= 3:
        xmiy3, xpiy3, z3 = xmiy2 * xmiy, xpiy2 * xpiy, z2 * z
        sh_3_0 = 1 / 8 * math.sqrt(35 / math.pi) * xmiy3
        sh_3_1 = 1 / 4 * math.sqrt(105 / (2 * math.pi)) * xmiy2 * z
        sh_3_2 = 1 / 8 * math.sqrt(21 / math.pi) * xmiy * (5 * z2 - 1)
        sh_3_3 = 1 / 4 * math.sqrt(7 / math.pi) * (5 * z3 - 3 * z)
        sh_3_4 = -1 / 8 * math.sqrt(21 / math.pi) * xpiy * (5 * z2 - 1)
        sh_3_5 = 1 / 4 * math.sqrt(105 / (2 * math.pi)) * xpiy2 * z
        sh_3_6 = -1 / 8 * math.sqrt(35 / math.pi) * xpiy3
        out += [sh_3_0, sh_3_1, sh_3_2, sh_3_3, sh_3_4, sh_3_5, sh_3_6]
    if lmax >= 4:
        out += [
            0.935414346693485 * sh_3_0 * zr + 0.935414346693485 * sh_3_6 * xr,
            0.661437827766148 * sh_3_0 * yr + 0.810092587300982 * sh_3_1 * zr
            + 0.810092587300983 * sh_3_5 * xr,
            -0.176776695296637 * sh_3_0 * zr + 0.866025403784439 * sh_3_1 * yr
            + 0.684653196881458 * sh_3_2 * zr + 0.684653196881457 * sh_3_4 * xr
            + 0.176776695296637 * sh_3_6 * xr,
            -0.306186217847897 * sh_3_1 * zr + 0.968245836551855 * sh_3_2 * yr
            + 0.790569415042095 * sh_3_3 * xr + 0.306186217847897 * sh_3_5 * xr,
            -0.612372435695795 * sh_3_2 * xr + sh_3_3 * yr
            - 0.612372435695795 * sh_3_4 * zr,
            -0.306186217847897 * sh_3_1 * xr + 0.790569415042096 * sh_3_3 * zr
            + 0.968245836551854 * sh_3_4 * yr - 0.306186217847897 * sh_3_5 * zr,
            -0.176776695296637 * sh_3_0 * xr - 0.684653196881457 * sh_3_2 * xr
            + 0.684653196881457 * sh_3_4 * zr + 0.866025403784439 * sh_3_5 * yr
            - 0.176776695296637 * sh_3_6 * zr,
            -0.810092587300982 * sh_3_1 * xr + 0.810092587300982 * sh_3_5 * zr
            + 0.661437827766148 * sh_3_6 * yr,
            -0.935414346693485 * sh_3_0 * xr + 0.935414346693486 * sh_3_6 * zr,
        ]
    sh = jnp.stack(out[:(lmax + 1) ** 2], axis=-1)
    return sh * math.sqrt(4 * math.pi)


if __name__ == "__main__":
    key = jax.random.PRNGKey(0)
    x = jax.random.normal(key, (2, 64, 3), dtype=jnp.float32)  # 128 points total

    for lmax in (3, 4):
        sh = spherical_harmonics(x, lmax=lmax, normalize=True)
        sh = jax.block_until_ready(sh)

        ref = _reference(x, lmax, True)
        assert sh.shape == (2, 64, (lmax + 1) ** 2)
        assert sh.dtype == jnp.complex64
        assert jnp.allclose(sh, ref, rtol=1e-5, atol=1e-5), f"mismatch vs reference (lmax={lmax})"

    print("KERNEL_OK")
</pallas_src>

<mosaic_0001>
module attributes {stable_mosaic.version = 11 : i64} {
  func.func @kernel(%arg0: i32, %arg1: memref<3x8x128xf32, #tpu.memory_space<vmem>>, %arg2: memref<16x8x128xf32, #tpu.memory_space<vmem>>, %arg3: memref<16x8x128xf32, #tpu.memory_space<vmem>>) attributes {dimension_semantics = [#tpu.dimension_semantics<parallel>], iteration_bounds = array<i64: 1>, scalar_prefetch = 0 : i64, scratch_operands = 0 : i64, tpu.core_type = #tpu.core_type<tc>, window_params = [{transform_indices = @transform_0, window_bounds = array<i64: 3, 8, 128>}, {transform_indices = @transform_1, window_bounds = array<i64: 16, 8, 128>}, {transform_indices = @transform_2, window_bounds = array<i64: 16, 8, 128>}]} {
    %cst = arith.constant 1.000000e+00 : f32
    %0 = vector.broadcast %cst : f32 to vector<8x128xf32>
    %cst_0 = arith.constant 0.000000e+00 : f32
    %1 = vector.broadcast %cst_0 : f32 to vector<8x128xf32>
    %c0 = arith.constant 0 : index
    %c0_1 = arith.constant 0 : index
    %c0_2 = arith.constant 0 : index
    %2 = vector.load %arg1[%c0, %c0_1, %c0_2] : memref<3x8x128xf32, #tpu.memory_space<vmem>>, vector<1x8x128xf32>
    %3 = vector.shape_cast %2 : vector<1x8x128xf32> to vector<8x128xf32>
    %c1 = arith.constant 1 : index
    %c0_3 = arith.constant 0 : index
    %c0_4 = arith.constant 0 : index
    %4 = vector.load %arg1[%c1, %c0_3, %c0_4] : memref<3x8x128xf32, #tpu.memory_space<vmem>>, vector<1x8x128xf32>
    %5 = vector.shape_cast %4 : vector<1x8x128xf32> to vector<8x128xf32>
    %c2 = arith.constant 2 : index
    %c0_5 = arith.constant 0 : index
    %c0_6 = arith.constant 0 : index
    %6 = vector.load %arg1[%c2, %c0_5, %c0_6] : memref<3x8x128xf32, #tpu.memory_space<vmem>>, vector<1x8x128xf32>
    %7 = vector.shape_cast %6 : vector<1x8x128xf32> to vector<8x128xf32>
    %8 = arith.mulf %3, %3 : vector<8x128xf32>
    %9 = arith.mulf %5, %5 : vector<8x128xf32>
    %10 = arith.addf %8, %9 : vector<8x128xf32>
    %11 = arith.mulf %7, %7 : vector<8x128xf32>
    %12 = arith.addf %10, %11 : vector<8x128xf32>
    %cst_7 = arith.constant 1.000000e-24 : f32
    %13 = vector.broadcast %cst_7 : f32 to vector<8x128xf32>
    %14 = arith.maximumf %12, %13 : vector<8x128xf32>
    %15 = math.rsqrt %14 : vector<8x128xf32>
    %16 = arith.mulf %3, %15 : vector<8x128xf32>
    %17 = arith.mulf %5, %15 : vector<8x128xf32>
    %18 = arith.mulf %7, %15 : vector<8x128xf32>
    %c0_8 = arith.constant 0 : index
    %c0_9 = arith.constant 0 : index
    %c0_10 = arith.constant 0 : index
    %19 = vector.load %arg2[%c0_8, %c0_9, %c0_10] : memref<16x8x128xf32, #tpu.memory_space<vmem>>, vector<1x8x128xf32>
    %20 = vector.shape_cast %19 : vector<1x8x128xf32> to vector<8x128xf32>
    %21 = vector.shape_cast %0 : vector<8x128xf32> to vector<1x8x128xf32>
    tpu.vector_store %arg2[%c0_8, %c0_9, %c0_10], %21 {strides = array<i32>} : memref<16x8x128xf32, #tpu.memory_space<vmem>>, vector<1x8x128xf32>,
    %c0_11 = arith.constant 0 : index
    %c0_12 = arith.constant 0 : index
    %c0_13 = arith.constant 0 : index
    %22 = vector.load %arg3[%c0_11, %c0_12, %c0_13] : memref<16x8x128xf32, #tpu.memory_space<vmem>>, vector<1x8x128xf32>
    %23 = vector.shape_cast %22 : vector<1x8x128xf32> to vector<8x128xf32>
    %24 = vector.shape_cast %1 : vector<8x128xf32> to vector<1x8x128xf32>
    tpu.vector_store %arg3[%c0_11, %c0_12, %c0_13], %24 {strides = array<i32>} : memref<16x8x128xf32, #tpu.memory_space<vmem>>, vector<1x8x128xf32>,
    %cst_14 = arith.constant 0.000000e+00 : f32
    %25 = vector.broadcast %cst_14 : f32 to vector<8x128xf32>
    %26 = arith.subf %25, %17 : vector<8x128xf32>
    %cst_15 = arith.constant 1.22474492 : f32
    %27 = vector.broadcast %cst_15 : f32 to vector<8x128xf32>
    %28 = arith.mulf %27, %16 : vector<8x128xf32>
    %cst_16 = arith.constant 1.22474492 : f32
    %29 = vector.broadcast %cst_16 : f32 to vector<8x128xf32>
    %30 = arith.mulf %29, %26 : vector<8x128xf32>
    %c1_17 = arith.constant 1 : index
    %c0_18 = arith.constant 0 : index
    %c0_19 = arith.constant 0 : index
    %31 = vector.load %arg2[%c1_17, %c0_18, %c0_19] : memref<16x8x128xf32, #tpu.memory_space<vmem>>, vector<1x8x128xf32>
    %32 = vector.shape_cast %31 : vector<1x8x128xf32> to vector<8x128xf32>
    %33 = vector.shape_cast %28 : vector<8x128xf32> to vector<1x8x128xf32>
    tpu.vector_store %arg2[%c1_17, %c0_18, %c0_19], %33 {strides = array<i32>} : memref<16x8x128xf32, #tpu.memory_space<vmem>>, vector<1x8x128xf32>,
    %c1_20 = arith.constant 1 : index
    %c0_21 = arith.constant 0 : index
    %c0_22 = arith.constant 0 : index
    %34 = vector.load %arg3[%c1_20, %c0_21, %c0_22] : memref<16x8x128xf32, #tpu.memory_space<vmem>>, vector<1x8x128xf32>
    %35 = vector.shape_cast %34 : vector<1x8x128xf32> to vector<8x128xf32>
    %36 = vector.shape_cast %30 : vector<8x128xf32> to vector<1x8x128xf32>
    tpu.vector_store %arg3[%c1_20, %c0_21, %c0_22], %36 {strides = array<i32>} : memref<16x8x128xf32, #tpu.memory_space<vmem>>, vector<1x8x128xf32>,
    %cst_23 = arith.constant 1.73205078 : f32
    %37 = vector.broadcast %cst_23 : f32 to vector<8x128xf32>
    %38 = arith.mulf %37, %18 : vector<8x128xf32>
    %c2_24 = arith.constant 2 : index
    %c0_25 = arith.constant 0 : index
    %c0_26 = arith.constant 0 : index
    %39 = vector.load %arg2[%c2_24, %c0_25, %c0_26] : memref<16x8x128xf32, #tpu.memory_space<vmem>>, vector<1x8x128xf32>
    %40 = vector.shape_cast %39 : vector<1x8x128xf32> to vector<8x128xf32>
    %41 = vector.shape_cast %38 : vector<8x128xf32> to vector<1x8x128xf32>
    tpu.vector_store %arg2[%c2_24, %c0_25, %c0_26], %41 {strides = array<i32>} : memref<16x8x128xf32, #tpu.memory_space<vmem>>, vector<1x8x128xf32>,
    %c2_27 = arith.constant 2 : index
    %c0_28 = arith.constant 0 : index
    %c0_29 = arith.constant 0 : index
    %42 = vector.load %arg3[%c2_27, %c0_28, %c0_29] : memref<16x8x128xf32, #tpu.memory_space<vmem>>, vector<1x8x128xf32>
    %43 = vector.shape_cast %42 : vector<1x8x128xf32> to vector<8x128xf32>
    %44 = vector.shape_cast %1 : vector<8x128xf32> to vector<1x8x128xf32>
    tpu.vector_store %arg3[%c2_27, %c0_28, %c0_29], %44 {strides = array<i32>} : memref<16x8x128xf32, #tpu.memory_space<vmem>>, vector<1x8x128xf32>,
    %cst_30 = arith.constant -1.22474492 : f32
    %45 = vector.broadcast %cst_30 : f32 to vector<8x128xf32>
    %46 = arith.mulf %45, %16 : vector<8x128xf32>
    %cst_31 = arith.constant -1.22474492 : f32
    %47 = vector.broadcast %cst_31 : f32 to vector<8x128xf32>
    %48 = arith.mulf %47, %17 : vector<8x128xf32>
    %c3 = arith.constant 3 : index
    %c0_32 = arith.constant 0 : index
    %c0_33 = arith.constant 0 : index
    %49 = vector.load %arg2[%c3, %c0_32, %c0_33] : memref<16x8x128xf32, #tpu.memory_space<vmem>>, vector<1x8x128xf32>
    %50 = vector.shape_cast %49 : vector<1x8x128xf32> to vector<8x128xf32>
    %51 = vector.shape_cast %46 : vector<8x128xf32> to vector<1x8x128xf32>
    tpu.vector_store %arg2[%c3, %c0_32, %c0_33], %51 {strides = array<i32>} : memref<16x8x128xf32, #tpu.memory_space<vmem>>, vector<1x8x128xf32>,
    %c3_34 = arith.constant 3 : index
    %c0_35 = arith.constant 0 : index
    %c0_36 = arith.constant 0 : index
    %52 = vector.load %arg3[%c3_34, %c0_35, %c0_36] : memref<16x8x128xf32, #tpu.memory_space<vmem>>, vector<1x8x128xf32>
    %53 = vector.shape_cast %52 : vector<1x8x128xf32> to vector<8x128xf32>
    %54 = vector.shape_cast %48 : vector<8x128xf32> to vector<1x8x128xf32>
    tpu.vector_store %arg3[%c3_34, %c0_35, %c0_36], %54 {strides = array<i32>} : memref<16x8x128xf32, #tpu.memory_space<vmem>>, vector<1x8x128xf32>,
    %55 = arith.mulf %16, %16 : vector<8x128xf32>
    %56 = arith.mulf %26, %26 : vector<8x128xf32>
    %57 = arith.subf %55, %56 : vector<8x128xf32>
    %58 = arith.mulf %16, %26 : vector<8x128xf32>
    %59 = arith.mulf %26, %16 : vector<8x128xf32>
    %60 = arith.addf %58, %59 : vector<8x128xf32>
    %61 = arith.mulf %18, %16 : vector<8x128xf32>
    %62 = arith.mulf %18, %26 : vector<8x128xf32>
    %63 = arith.mulf %18, %18 : vector<8x128xf32>
    %cst_37 = arith.constant 1.36930645 : f32
    %64 = vector.broadcast %cst_37 : f32 to vector<8x128xf32>
    %65 = arith.mulf %64, %57 : vector<8x128xf32>
    %cst_38 = arith.constant 1.36930645 : f32
    %66 = vector.broadcast %cst_38 : f32 to vector<8x128xf32>
    %67 = arith.mulf %66, %60 : vector<8x128xf32>
    %c4 = arith.constant 4 : index
    %c0_39 = arith.constant 0 : index
    %c0_40 = arith.constant 0 : index
    %68 = vector.load %arg2[%c4, %c0_39, %c0_40] : memref<16x8x128xf32, #tpu.memory_space<vmem>>, vector<1x8x128xf32>
    %69 = vector.shape_cast %68 : vector<1x8x128xf32> to vector<8x128xf32>
    %70 = vector.shape_cast %65 : vector<8x128xf32> to vector<1x8x128xf32>
    tpu.vector_store %arg2[%c4, %c0_39, %c0_40], %70 {strides = array<i32>} : memref<16x8x128xf32, #tpu.memory_space<vmem>>, vector<1x8x128xf32>,
    %c4_41 = arith.constant 4 : index
    %c0_42 = arith.constant 0 : index
    %c0_43 = arith.constant 0 : index
    %71 = vector.load %arg3[%c4_41, %c0_42, %c0_43] : memref<16x8x128xf32, #tpu.memory_space<vmem>>, vector<1x8x128xf32>
    %72 = vector.shape_cast %71 : vector<1x8x128xf32> to vector<8x128xf32>
    %73 = vector.shape_cast %67 : vector<8x128xf32> to vector<1x8x128xf32>
    tpu.vector_store %arg3[%c4_41, %c0_42, %c0_43], %73 {strides = array<i32>} : memref<16x8x128xf32, #tpu.memory_space<vmem>>, vector<1x8x128xf32>,
    %cst_44 = arith.constant 2.73861289 : f32
    %74 = vector.broadcast %cst_44 : f32 to vector<8x128xf32>
    %75 = arith.mulf %74, %61 : vector<8x128xf32>
    %cst_45 = arith.constant 2.73861289 : f32
    %76 = vector.broadcast %cst_45 : f32 to vector<8x128xf32>
    %77 = arith.mulf %76, %62 : vector<8x128xf32>
    %c5 = arith.constant 5 : index
    %c0_46 = arith.constant 0 : index
    %c0_47 = arith.constant 0 : index
    %78 = vector.load %arg2[%c5, %c0_46, %c0_47] : memref<16x8x128xf32, #tpu.memory_space<vmem>>, vector<1x8x128xf32>
    %79 = vector.shape_cast %78 : vector<1x8x128xf32> to vector<8x128xf32>
    %80 = vector.shape_cast %75 : vector<8x128xf32> to vector<1x8x128xf32>
    tpu.vector_store %arg2[%c5, %c0_46, %c0_47], %80 {strides = array<i32>} : memref<16x8x128xf32, #tpu.memory_space<vmem>>, vector<1x8x128xf32>,
    %c5_48 = arith.constant 5 : index
    %c0_49 = arith.constant 0 : index
    %c0_50 = arith.constant 0 : index
    %81 = vector.load %arg3[%c5_48, %c0_49, %c0_50] : memref<16x8x128xf32, #tpu.memory_space<vmem>>, vector<1x8x128xf32>
    %82 = vector.shape_cast %81 : vector<1x8x128xf32> to vector<8x128xf32>
    %83 = vector.shape_cast %77 : vector<8x128xf32> to vector<1x8x128xf32>
    tpu.vector_store %arg3[%c5_48, %c0_49, %c0_50], %83 {strides = array<i32>} : memref<16x8x128xf32, #tpu.memory_space<vmem>>, vector<1x8x128xf32>,
    %cst_51 = arith.constant 3.000000e+00 : f32
    %84 = vector.broadcast %cst_51 : f32 to vector<8x128xf32>
    %85 = arith.mulf %84, %63 : vector<8x128xf32>
    %cst_52 = arith.constant 1.000000e+00 : f32
    %86 = vector.broadcast %cst_52 : f32 to vector<8x128xf32>
    %87 = arith.subf %85, %86 : vector<8x128xf32>
    %cst_53 = arith.constant 1.11803401 : f32
    %88 = vector.broadcast %cst_53 : f32 to vector<8x128xf32>
    %89 = arith.mulf %88, %87 : vector<8x128xf32>
    %c6 = arith.constant 6 : index
    %c0_54 = arith.constant 0 : index
    %c0_55 = arith.constant 0 : index
    %90 = vector.load %arg2[%c6, %c0_54, %c0_55] : memref<16x8x128xf32, #tpu.memory_space<vmem>>, vector<1x8x128xf32>
    %91 = vector.shape_cast %90 : vector<1x8x128xf32> to vector<8x128xf32>
    %92 = vector.shape_cast %89 : vector<8x128xf32> to vector<1x8x128xf32>
    tpu.vector_store %arg2[%c6, %c0_54, %c0_55], %92 {strides = array<i32>} : memref<16x8x128xf32, #tpu.memory_space<vmem>>, vector<1x8x128xf32>,
    %c6_56 = arith.constant 6 : index
    %c0_57 = arith.constant 0 : index
    %c0_58 = arith.constant 0 : index
    %93 = vector.load %arg3[%c6_56, %c0_57, %c0_58] : memref<16x8x128xf32, #tpu.memory_space<vmem>>, vector<1x8x128xf32>
    %94 = vector.shape_cast %93 : vector<1x8x128xf32> to vector<8x128xf32>
    %95 = vector.shape_cast %1 : vector<8x128xf32> to vector<1x8x128xf32>
    tpu.vector_store %arg3[%c6_56, %c0_57, %c0_58], %95 {strides = array<i32>} : memref<16x8x128xf32, #tpu.memory_space<vmem>>, vector<1x8x128xf32>,
    %cst_59 = arith.constant 0.000000e+00 : f32
    %96 = vector.broadcast %cst_59 : f32 to vector<8x128xf32>
    %97 = arith.subf %96, %62 : vector<8x128xf32>
    %cst_60 = arith.constant -2.73861289 : f32
    %98 = vector.broadcast %cst_60 : f32 to vector<8x128xf32>
    %99 = arith.mulf %98, %61 : vector<8x128xf32>
    %cst_61 = arith.constant -2.73861289 : f32
    %100 = vector.broadcast %cst_61 : f32 to vector<8x128xf32>
    %101 = arith.mulf %100, %97 : vector<8x128xf32>
    %c7 = arith.constant 7 : index
    %c0_62 = arith.constant 0 : index
    %c0_63 = arith.constant 0 : index
    %102 = vector.load %arg2[%c7, %c0_62, %c0_63] : memref<16x8x128xf32, #tpu.memory_space<vmem>>, vector<1x8x128xf32>
    %103 = vector.shape_cast %102 : vector<1x8x128xf32> to vector<8x128xf32>
    %104 = vector.shape_cast %99 : vector<8x128xf32> to vector<1x8x128xf32>
    tpu.vector_store %arg2[%c7, %c0_62, %c0_63], %104 {strides = array<i32>} : memref<16x8x128xf32, #tpu.memory_space<vmem>>, vector<1x8x128xf32>,
    %c7_64 = arith.constant 7 : index
    %c0_65 = arith.constant 0 : index
    %c0_66 = arith.constant 0 : index
    %105 = vector.load %arg3[%c7_64, %c0_65, %c0_66] : memref<16x8x128xf32, #tpu.memory_space<vmem>>, vector<1x8x128xf32>
    %106 = vector.shape_cast %105 : vector<1x8x128xf32> to vector<8x128xf32>
    %107 = vector.shape_cast %101 : vector<8x128xf32> to vector<1x8x128xf32>
    tpu.vector_store %arg3[%c7_64, %c0_65, %c0_66], %107 {strides = array<i32>} : memref<16x8x128xf32, #tpu.memory_space<vmem>>, vector<1x8x128xf32>,
    %cst_67 = arith.constant 0.000000e+00 : f32
    %108 = vector.broadcast %cst_67 : f32 to vector<8x128xf32>
    %109 = arith.subf %108, %60 : vector<8x128xf32>
    %cst_68 = arith.constant 1.36930645 : f32
    %110 = vector.broadcast %cst_68 : f32 to vector<8x128xf32>
    %111 = arith.mulf %110, %57 : vector<8x128xf32>
    %cst_69 = arith.constant 1.36930645 : f32
    %112 = vector.broadcast %cst_69 : f32 to vector<8x128xf32>
    %113 = arith.mulf %112, %109 : vector<8x128xf32>
    %c8 = arith.constant 8 : index
    %c0_70 = arith.constant 0 : index
    %c0_71 = arith.constant 0 : index
    %114 = vector.load %arg2[%c8, %c0_70, %c0_71] : memref<16x8x128xf32, #tpu.memory_space<vmem>>, vector<1x8x128xf32>
    %115 = vector.shape_cast %114 : vector<1x8x128xf32> to vector<8x128xf32>
    %116 = vector.shape_cast %111 : vector<8x128xf32> to vector<1x8x128xf32>
    tpu.vector_store %arg2[%c8, %c0_70, %c0_71], %116 {strides = array<i32>} : memref<16x8x128xf32, #tpu.memory_space<vmem>>, vector<1x8x128xf32>,
    %c8_72 = arith.constant 8 : index
    %c0_73 = arith.constant 0 : index
    %c0_74 = arith.constant 0 : index
    %117 = vector.load %arg3[%c8_72, %c0_73, %c0_74] : memref<16x8x128xf32, #tpu.memory_space<vmem>>, vector<1x8x128xf32>
    %118 = vector.shape_cast %117 : vector<1x8x128xf32> to vector<8x128xf32>
    %119 = vector.shape_cast %113 : vector<8x128xf32> to vector<1x8x128xf32>
    tpu.vector_store %arg3[%c8_72, %c0_73, %c0_74], %119 {strides = array<i32>} : memref<16x8x128xf32, #tpu.memory_space<vmem>>, vector<1x8x128xf32>,
    %120 = arith.mulf %57, %16 : vector<8x128xf32>
    %121 = arith.mulf %60, %26 : vector<8x128xf32>
    %122 = arith.subf %120, %121 : vector<8x128xf32>
    %123 = arith.mulf %57, %26 : vector<8x128xf32>
    %124 = arith.mulf %60, %16 : vector<8x128xf32>
    %125 = arith.addf %123, %124 : vector<8x128xf32>
    %cst_75 = arith.constant 5.000000e+00 : f32
    %126 = vector.broadcast %cst_75 : f32 to vector<8x128xf32>
    %127 = arith.mulf %126, %63 : vector<8x128xf32>
    %cst_76 = arith.constant 1.000000e+00 : f32
    %128 = vector.broadcast %cst_76 : f32 to vector<8x128xf32>
    %129 = arith.subf %127, %128 : vector<8x128xf32>
    %cst_77 = arith.constant 1.479020e+00 : f32
    %130 = vector.broadcast %cst_77 : f32 to vector<8x128xf32>
    %131 = arith.mulf %130, %122 : vector<8x128xf32>
    %cst_78 = arith.constant 1.479020e+00 : f32
    %132 = vector.broadcast %cst_78 : f32 to vector<8x128xf32>
    %133 = arith.mulf %132, %125 : vector<8x128xf32>
    %134 = arith.mulf %18, %57 : vector<8x128xf32>
    %135 = arith.mulf %18, %60 : vector<8x128xf32>
    %cst_79 = arith.constant 3.62284422 : f32
    %136 = vector.broadcast %cst_79 : f32 to vector<8x128xf32>
    %137 = arith.mulf %136, %134 : vector<8x128xf32>
    %cst_80 = arith.constant 3.62284422 : f32
    %138 = vector.broadcast %cst_80 : f32 to vector<8x128xf32>
    %139 = arith.mulf %138, %135 : vector<8x128xf32>
    %140 = arith.mulf %129, %16 : vector<8x128xf32>
    %141 = arith.mulf %129, %26 : vector<8x128xf32>
    %cst_81 = arith.constant 1.14564395 : f32
    %142 = vector.broadcast %cst_81 : f32 to vector<8x128xf32>
    %143 = arith.mulf %142, %140 : vector<8x128xf32>
    %cst_82 = arith.constant 1.14564395 : f32
    %144 = vector.broadcast %cst_82 : f32 to vector<8x128xf32>
    %145 = arith.mulf %144, %141 : vector<8x128xf32>
    %cst_83 = arith.constant 5.000000e+00 : f32
    %146 = vector.broadcast %cst_83 : f32 to vector<8x128xf32>
    %147 = arith.mulf %146, %63 : vector<8x128xf32>
    %148 = arith.mulf %147, %18 : vector<8x128xf32>
    %cst_84 = arith.constant 3.000000e+00 : f32
    %149 = vector.broadcast %cst_84 : f32 to vector<8x128xf32>
    %150 = arith.mulf %149, %18 : vector<8x128xf32>
    %151 = arith.subf %148, %150 : vector<8x128xf32>
    %cst_85 = arith.constant 1.32287562 : f32
    %152 = vector.broadcast %cst_85 : f32 to vector<8x128xf32>
    %153 = arith.mulf %152, %151 : vector<8x128xf32>
    %cst_86 = arith.constant 0.000000e+00 : f32
    %154 = vector.broadcast %cst_86 : f32 to vector<8x128xf32>
    %155 = arith.subf %154, %145 : vector<8x128xf32>
    %cst_87 = arith.constant 0.000000e+00 : f32
    %156 = vector.broadcast %cst_87 : f32 to vector<8x128xf32>
    %157 = arith.subf %156, %143 : vector<8x128xf32>
    %cst_88 = arith.constant 0.000000e+00 : f32
    %158 = vector.broadcast %cst_88 : f32 to vector<8x128xf32>
    %159 = arith.subf %158, %155 : vector<8x128xf32>
    %cst_89 = arith.constant 0.000000e+00 : f32
    %160 = vector.broadcast %cst_89 : f32 to vector<8x128xf32>
    %161 = arith.subf %160, %139 : vector<8x128xf32>
    %cst_90 = arith.constant 0.000000e+00 : f32
    %162 = vector.broadcast %cst_90 : f32 to vector<8x128xf32>
    %163 = arith.subf %162, %133 : vector<8x128xf32>
    %cst_91 = arith.constant 0.000000e+00 : f32
    %164 = vector.broadcast %cst_91 : f32 to vector<8x128xf32>
    %165 = arith.subf %164, %131 : vector<8x128xf32>
    %cst_92 = arith.constant 0.000000e+00 : f32
    %166 = vector.broadcast %cst_92 : f32 to vector<8x128xf32>
    %167 = arith.subf %166, %163 : vector<8x128xf32>
    %c9 = arith.constant 9 : index
    %c0_93 = arith.constant 0 : index
    %c0_94 = arith.constant 0 : index
    %168 = vector.load %arg2[%c9, %c0_93, %c0_94] : memref<16x8x128xf32, #tpu.memory_space<vmem>>, vector<1x8x128xf32>
    %169 = vector.shape_cast %168 : vector<1x8x128xf32> to vector<8x128xf32>
    %170 = vector.shape_cast %131 : vector<8x128xf32> to vector<1x8x128xf32>
    tpu.vector_store %arg2[%c9, %c0_93, %c0_94], %170 {strides = array<i32>} : memref<16x8x128xf32, #tpu.memory_space<vmem>>, vector<1x8x128xf32>,
    %c9_95 = arith.constant 9 : index
    %c0_96 = arith.constant 0 : index
    %c0_97 = arith.constant 0 : index
    %171 = vector.load %arg3[%c9_95, %c0_96, %c0_97] : memref<16x8x128xf32, #tpu.memory_space<vmem>>, vector<1x8x128xf32>
    %172 = vector.shape_cast %171 : vector<1x8x128xf32> to vector<8x128xf32>
    %173 = vector.shape_cast %133 : vector<8x128xf32> to vector<1x8x128xf32>
    tpu.vector_store %arg3[%c9_95, %c0_96, %c0_97], %173 {strides = array<i32>} : memref<16x8x128xf32, #tpu.memory_space<vmem>>, vector<1x8x128xf32>,
    %c10 = arith.constant 10 : index
    %c0_98 = arith.constant 0 : index
    %c0_99 = arith.constant 0 : index
    %174 = vector.load %arg2[%c10, %c0_98, %c0_99] : memref<16x8x128xf32, #tpu.memory_space<vmem>>, vector<1x8x128xf32>
    %175 = vector.shape_cast %174 : vector<1x8x128xf32> to vector<8x128xf32>
    %176 = vector.shape_cast %137 : vector<8x128xf32> to vector<1x8x128xf32>
    tpu.vector_store %arg2[%c10, %c0_98, %c0_99], %176 {strides = array<i32>} : memref<16x8x128xf32, #tpu.memory_space<vmem>>, vector<1x8x128xf32>,
    %c10_100 = arith.constant 10 : index
    %c0_101 = arith.constant 0 : index
    %c0_102 = arith.constant 0 : index
    %177 = vector.load %arg3[%c10_100, %c0_101, %c0_102] : memref<16x8x128xf32, #tpu.memory_space<vmem>>, vector<1x8x128xf32>
    %178 = vector.shape_cast %177 : vector<1x8x128xf32> to vector<8x128xf32>
    %179 = vector.shape_cast %139 : vector<8x128xf32> to vector<1x8x128xf32>
    tpu.vector_store %arg3[%c10_100, %c0_101, %c0_102], %179 {strides = array<i32>} : memref<16x8x128xf32, #tpu.memory_space<vmem>>, vector<1x8x128xf32>,
    %c11 = arith.constant 11 : index
    %c0_103 = arith.constant 0 : index
    %c0_104 = arith.constant 0 : index
    %180 = vector.load %arg2[%c11, %c0_103, %c0_104] : memref<16x8x128xf32, #tpu.memory_space<vmem>>, vector<1x8x128xf32>
    %181 = vector.shape_cast %180 : vector<1x8x128xf32> to vector<8x128xf32>
    %182 = vector.shape_cast %143 : vector<8x128xf32> to vector<1x8x128xf32>
    tpu.vector_store %arg2[%c11, %c0_103, %c0_104], %182 {strides = array<i32>} : memref<16x8x128xf32, #tpu.memory_space<vmem>>, vector<1x8x128xf32>,
    %c11_105 = arith.constant 11 : index
    %c0_106 = arith.constant 0 : index
    %c0_107 = arith.constant 0 : index
    %183 = vector.load %arg3[%c11_105, %c0_106, %c0_107] : memref<16x8x128xf32, #tpu.memory_space<vmem>>, vector<1x8x128xf32>
    %184 = vector.shape_cast %183 : vector<1x8x128xf32> to vector<8x128xf32>
    %185 = vector.shape_cast %145 : vector<8x128xf32> to vector<1x8x128xf32>
    tpu.vector_store %arg3[%c11_105, %c0_106, %c0_107], %185 {strides = array<i32>} : memref<16x8x128xf32, #tpu.memory_space<vmem>>, vector<1x8x128xf32>,
    %c12 = arith.constant 12 : index
    %c0_108 = arith.constant 0 : index
    %c0_109 = arith.constant 0 : index
    %186 = vector.load %arg2[%c12, %c0_108, %c0_109] : memref<16x8x128xf32, #tpu.memory_space<vmem>>, vector<1x8x128xf32>
    %187 = vector.shape_cast %186 : vector<1x8x128xf32> to vector<8x128xf32>
    %188 = vector.shape_cast %153 : vector<8x128xf32> to vector<1x8x128xf32>
    tpu.vector_store %arg2[%c12, %c0_108, %c0_109], %188 {strides = array<i32>} : memref<16x8x128xf32, #tpu.memory_space<vmem>>, vector<1x8x128xf32>,
    %c12_110 = arith.constant 12 : index
    %c0_111 = arith.constant 0 : index
    %c0_112 = arith.constant 0 : index
    %189 = vector.load %arg3[%c12_110, %c0_111, %c0_112] : memref<16x8x128xf32, #tpu.memory_space<vmem>>, vector<1x8x128xf32>
    %190 = vector.shape_cast %189 : vector<1x8x128xf32> to vector<8x128xf32>
    %191 = vector.shape_cast %1 : vector<8x128xf32> to vector<1x8x128xf32>
    tpu.vector_store %arg3[%c12_110, %c0_111, %c0_112], %191 {strides = array<i32>} : memref<16x8x128xf32, #tpu.memory_space<vmem>>, vector<1x8x128xf32>,
    %c13 = arith.constant 13 : index
    %c0_113 = arith.constant 0 : index
    %c0_114 = arith.constant 0 : index
    %192 = vector.load %arg2[%c13, %c0_113, %c0_114] : memref<16x8x128xf32, #tpu.memory_space<vmem>>, vector<1x8x128xf32>
    %193 = vector.shape_cast %192 : vector<1x8x128xf32> to vector<8x128xf32>
    %194 = vector.shape_cast %157 : vector<8x128xf32> to vector<1x8x128xf32>
    tpu.vector_store %arg2[%c13, %c0_113, %c0_114], %194 {strides = array<i32>} : memref<16x8x128xf32, #tpu.memory_space<vmem>>, vector<1x8x128xf32>,
    %c13_115 = arith.constant 13 : index
    %c0_116 = arith.constant 0 : index
    %c0_117 = arith.constant 0 : index
    %195 = vector.load %arg3[%c13_115, %c0_116, %c0_117] : memref<16x8x128xf32, #tpu.memory_space<vmem>>, vector<1x8x128xf32>
    %196 = vector.shape_cast %195 : vector<1x8x128xf32> to vector<8x128xf32>
    %197 = vector.shape_cast %159 : vector<8x128xf32> to vector<1x8x128xf32>
    tpu.vector_store %arg3[%c13_115, %c0_116, %c0_117], %197 {strides = array<i32>} : memref<16x8x128xf32, #tpu.memory_space<vmem>>, vector<1x8x128xf32>,
    %c14 = arith.constant 14 : index
    %c0_118 = arith.constant 0 : index
    %c0_119 = arith.constant 0 : index
    %198 = vector.load %arg2[%c14, %c0_118, %c0_119] : memref<16x8x128xf32, #tpu.memory_space<vmem>>, vector<1x8x128xf32>
    %199 = vector.shape_cast %198 : vector<1x8x128xf32> to vector<8x128xf32>
    %200 = vector.shape_cast %137 : vector<8x128xf32> to vector<1x8x128xf32>
    tpu.vector_store %arg2[%c14, %c0_118, %c0_119], %200 {strides = array<i32>} : memref<16x8x128xf32, #tpu.memory_space<vmem>>, vector<1x8x128xf32>,
    %c14_120 = arith.constant 14 : index
    %c0_121 = arith.constant 0 : index
    %c0_122 = arith.constant 0 : index
    %201 = vector.load %arg3[%c14_120, %c0_121, %c0_122] : memref<16x8x128xf32, #tpu.memory_space<vmem>>, vector<1x8x128xf32>
    %202 = vector.shape_cast %201 : vector<1x8x128xf32> to vector<8x128xf32>
    %203 = vector.shape_cast %161 : vector<8x128xf32> to vector<1x8x128xf32>
    tpu.vector_store %arg3[%c14_120, %c0_121, %c0_122], %203 {strides = array<i32>} : memref<16x8x128xf32, #tpu.memory_space<vmem>>, vector<1x8x128xf32>,
    %c15 = arith.constant 15 : index
    %c0_123 = arith.constant 0 : index
    %c0_124 = arith.constant 0 : index
    %204 = vector.load %arg2[%c15, %c0_123, %c0_124] : memref<16x8x128xf32, #tpu.memory_space<vmem>>, vector<1x8x128xf32>
    %205 = vector.shape_cast %204 : vector<1x8x128xf32> to vector<8x128xf32>
    %206 = vector.shape_cast %165 : vector<8x128xf32> to vector<1x8x128xf32>
    tpu.vector_store %arg2[%c15, %c0_123, %c0_124], %206 {strides = array<i32>} : memref<16x8x128xf32, #tpu.memory_space<vmem>>, vector<1x8x128xf32>,
    %c15_125 = arith.constant 15 : index
    %c0_126 = arith.constant 0 : index
    %c0_127 = arith.constant 0 : index
    %207 = vector.load %arg3[%c15_125, %c0_126, %c0_127] : memref<16x8x128xf32, #tpu.memory_space<vmem>>, vector<1x8x128xf32>
    %208 = vector.shape_cast %207 : vector<1x8x128xf32> to vector<8x128xf32>
    %209 = vector.shape_cast %167 : vector<8x128xf32> to vector<1x8x128xf32>
    tpu.vector_store %arg3[%c15_125, %c0_126, %c0_127], %209 {strides = array<i32>} : memref<16x8x128xf32, #tpu.memory_space<vmem>>, vector<1x8x128xf32>,
    return
  }
  func.func @transform_0(%arg0: i32) -> (i32, i32, i32) {
    %c0_i32 = arith.constant 0 : i32
    %c0_i32_0 = arith.constant 0 : i32
    %c0_i32_1 = arith.constant 0 : i32
    return %c0_i32, %arg0, %c0_i32_0 : i32, i32, i32
  }
  func.func @transform_1(%arg0: i32) -> (i32, i32, i32) {
    %c0_i32 = arith.constant 0 : i32
    %c0_i32_0 = arith.constant 0 : i32
    %c0_i32_1 = arith.constant 0 : i32
    return %c0_i32, %arg0, %c0_i32_0 : i32, i32, i32
  }
  func.func @transform_2(%arg0: i32) -> (i32, i32, i32) {
    %c0_i32 = arith.constant 0 : i32
    %c0_i32_0 = arith.constant 0 : i32
    %c0_i32_1 = arith.constant 0 : i32
    return %c0_i32, %arg0, %c0_i32_0 : i32, i32, i32
  }
}

</mosaic_0001>

<bundles_post_ra>
// kernel: custom-call
= control target key start
LH: loop header
LB: loop body
LE: loop exit
PB: predicated region body
PF: predicated region fallthrough
CT: control target
= control target key end

     0   :  { %s112_s0 = inlined_call_operand.vmem [shape: f32[2,64,16], index: 0, kind: input, shape index: {}]   ;;  %s113_s1 = inlined_call_operand.vmem [shape: f32[2,64,16], index: 1, kind: input, shape index: {}]   ;;  %s114_s2 = inlined_call_operand.vmem [shape: c64[2,64,16], index: 2, kind: output, shape index: {}]  }
   0x1   :  { %v5_v0 = vld [vmem:[%s112_s0] sm:$0xff]  ;;  %v36_v1 = vld [vmem:[%s112_s0 + $0x8] sm:$0xff]  ;;  %v38_v2 = vld [vmem:[%s112_s0 + $0x10] sm:$0xff] }
   0x2   :  { %6 = vst [vmem:[%s114_s2] sm:$0xff] %v5_v0  ;;  %37 = vst [vmem:[%s114_s2 + $0x8] sm:$0xff] %v36_v1  ;;  %v40_v3 = vld [vmem:[%s112_s0 + $0x18] sm:$0xff]  ;;  %v19_v4 = vld [vmem:[%s113_s1] sm:$0xff] }
   0x3   :  { %39 = vst [vmem:[%s114_s2 + $0x10] sm:$0xff] %v38_v2  ;;  %v43_v5 = vld [vmem:[%s113_s1 + $0x8] sm:$0xff]  ;;  %41 = vst [vmem:[%s114_s2 + $0x18] sm:$0xff] %v40_v3  ;;  %v45_v6 = vld [vmem:[%s113_s1 + $0x10] sm:$0xff] }
   0x4   :  { %42 = vst [vmem:[%s114_s2 + $0x20] sm:$0xff] %v19_v4  ;;  %44 = vst [vmem:[%s114_s2 + $0x28] sm:$0xff] %v43_v5  ;;  %v47_v7 = vld [vmem:[%s113_s1 + $0x18] sm:$0xff] }
   0x5   :  { %46 = vst [vmem:[%s114_s2 + $0x30] sm:$0xff] %v45_v6  ;;  %48 = vst [vmem:[%s114_s2 + $0x38] sm:$0xff] %v47_v7 }

// kernel: spherical_harmonics.1
= control target key start
LH: loop header
LB: loop body
LE: loop exit
PB: predicated region body
PF: predicated region fallthrough
CT: control target
= control target key end

     0   :  { %v188_v0 = vmov 1.0   ;;  %v189_v1 = vmov 0.0   ;;  %s310_s1 = inlined_call_operand.vmem [shape: f32[16,8,128], index: 1, kind: output, shape index: {0}]   ;;  %s311_s2 = inlined_call_operand.vmem [shape: f32[16,8,128], index: 2, kind: output, shape index: {1}]   ;;  %s312_s0 = inlined_call_operand.vmem [shape: f32[3,8,128], index: 0, kind: input, shape index: {}]  }
   0x1   :  { %25 = vst [vmem:[%s310_s1] sm:$0xff] %v188_v0  ;;  %26 = vst [vmem:[%s311_s2] sm:$0xff] %v189_v1  ;;  %v10_v2 = vld [vmem:[%s312_s0] sm:$0xff]  ;;  %v150_v3 = vld [vmem:[%s312_s0 + $0x8] sm:$0xff] }
   0x2   :  { %155 = vst [vmem:[%s311_s2 + $0x10] sm:$0xff] %v189_v1  ;;  %164 = vst [vmem:[%s311_s2 + $0x30] sm:$0xff] %v189_v1  ;;  %v151_v4 = vld [vmem:[%s312_s0 + $0x10] sm:$0xff]  ;;  %v15_v5 = vmul.f32 %v10_v2, %v10_v2  ;;  %v16_v6 = vmul.f32 %v150_v3, %v150_v3 }
   0x3   :  { %177 = vst [vmem:[%s311_s2 + $0x60] sm:$0xff] %v189_v1  ;;  %v18_v7 = vmul.f32 %v151_v4, %v151_v4 }
   0x4   :  { %v17_v8 = vadd.f32 %v16_v6, %v15_v5 }
   0x6   :  { %v19_v9 = vadd.f32 %v18_v7, %v17_v8 }
   0x8   :  { %v20_v10 = vmax.f32 %v19_v9, 1e-24 }
   0xa   :  { %186 = vrsqrt.f32 %v20_v10 }
  0x14   :  { %v187_v11 = vpop.eup %186 }
  0x15   :  { %v22_v12 = vmul.f32 %v187_v11, %v10_v2  ;;  %v23_v13 = vmul.f32 %v187_v11, %v150_v3  ;;  %v24_v14 = vmul.f32 %v187_v11, %v151_v4 }
  0x17   :  { %v28_v15 = vmul.f32 1.2247449, %v22_v12  ;;  %v27_v16 = vsub.f32 0.0, %v23_v13  ;;  %v34_v17 = vmul.f32 1.7320508, %v24_v14  ;;  %v45_v18 = vmul.f32 %v22_v12, %v22_v12 }
  0x18   :  { %v39_v19 = vmul.f32 -1.2247449, %v22_v12  ;;  %v40_v20 = vmul.f32 -1.2247449, %v23_v13  ;;  %v50_v21 = vmul.f32 %v24_v14, %v22_v12  ;;  %v52_v22 = vmul.f32 %v24_v14, %v24_v14 }
  0x19   :  { %152 = vst [vmem:[%s310_s1 + $0x8] sm:$0xff] %v28_v15  ;;  %v29_v23 = vmul.f32 1.2247449, %v27_v16  ;;  %154 = vst [vmem:[%s310_s1 + $0x10] sm:$0xff] %v34_v17  ;;  %v46_v24 = vmul.f32 %v27_v16, %v27_v16  ;;  %v48_v25 = vmul.f32 %v27_v16, %v22_v12  ;;  %v51_v26 = vmul.f32 %v27_v16, %v24_v14 }
  0x1a   :  { %156 = vst [vmem:[%s310_s1 + $0x18] sm:$0xff] %v39_v19  ;;  %157 = vst [vmem:[%s311_s2 + $0x18] sm:$0xff] %v40_v20  ;;  %v59_v27 = vmul.f32 2.738613, %v50_v21  ;;  %v65_v28 = vmul.f32 3.0, %v52_v22  ;;  %v91_v30 = vmul.f32 5.0, %v52_v22 }
  0x1b   :  { %v73_v29 = vmul.f32 -2.738613, %v50_v21  ;;  %153 = vst [vmem:[%s311_s2 + $0x8] sm:$0xff] %v29_v23  ;;  %v47_v31 = vsub.f32 %v45_v18, %v46_v24  ;;  %v49_v32 = vadd.f32 %v48_v25, %v48_v25  ;;  %v60_v33 = vmul.f32 2.738613, %v51_v26 }
  0x1c   :  { %v72_v34 = vsub.f32 0.0, %v51_v26  ;;  %160 = vst [vmem:[%s310_s1 + $0x28] sm:$0xff] %v59_v27  ;;  %v162_v35 = vadd.f32 -1.0, %v65_v28  ;;  %v169_v36 = vadd.f32 -1.0, %v91_v30  ;;  %v103_v37 = vmul.f32 %v91_v30, %v24_v14 }
  0x1d   :  { %165 = vst [vmem:[%s310_s1 + $0x38] sm:$0xff] %v73_v29  ;;  %v104_v38 = vmul.f32 3.0, %v24_v14  ;;  %v53_v39 = vmul.f32 1.3693064, %v47_v31  ;;  %v54_v40 = vmul.f32 1.3693064, %v49_v32  ;;  %v85_v42 = vmul.f32 %v47_v31, %v22_v12 }
  0x1e   :  { %161 = vst [vmem:[%s311_s2 + $0x28] sm:$0xff] %v60_v33  ;;  %v74_v41 = vmul.f32 -2.738613, %v72_v34  ;;  %v67_v43 = vmul.f32 1.118034, %v162_v35  ;;  %v79_v44 = vsub.f32 0.0, %v49_v32  ;;  %v86_v45 = vmul.f32 %v49_v32, %v27_v16 }
  0x1f   :  { %v88_v46 = vmul.f32 %v47_v31, %v27_v16  ;;  %158 = vst [vmem:[%s310_s1 + $0x20] sm:$0xff] %v53_v39  ;;  %167 = vst [vmem:[%s310_s1 + $0x40] sm:$0xff] %v53_v39  ;;  %v89_v47 = vmul.f32 %v49_v32, %v22_v12  ;;  %v95_v48 = vmul.f32 %v47_v31, %v24_v14 }
  0x20   :  { %159 = vst [vmem:[%s311_s2 + $0x20] sm:$0xff] %v54_v40  ;;  %166 = vst [vmem:[%s311_s2 + $0x38] sm:$0xff] %v74_v41  ;;  %v96_v49 = vmul.f32 %v49_v32, %v24_v14  ;;  %v99_v50 = vmul.f32 %v169_v36, %v22_v12  ;;  %v80_v51 = vmul.f32 1.3693064, %v79_v44  ;;  %v87_v52 = vsub.f32 %v85_v42, %v86_v45 }
  0x21   :  { %163 = vst [vmem:[%s310_s1 + $0x30] sm:$0xff] %v67_v43  ;;  %v100_v53 = vmul.f32 %v169_v36, %v27_v16  ;;  %v105_v54 = vsub.f32 %v103_v37, %v104_v38  ;;  %v90_v55 = vadd.f32 %v89_v47, %v88_v46  ;;  %v97_v56 = vmul.f32 3.6228442, %v95_v48 }
  0x22   :  { %v98_v57 = vmul.f32 3.6228442, %v96_v49  ;;  %v101_v58 = vmul.f32 1.145644, %v99_v50  ;;  %168 = vst [vmem:[%s311_s2 + $0x40] sm:$0xff] %v80_v51 }
  0x23   :  { %v93_v59 = vmul.f32 1.47902, %v87_v52  ;;  %v102_v60 = vmul.f32 1.145644, %v100_v53  ;;  %v106_v61 = vmul.f32 1.3228756, %v105_v54 }
  0x24   :  { %v94_v62 = vmul.f32 1.47902, %v90_v55  ;;  %172 = vst [vmem:[%s310_s1 + $0x50] sm:$0xff] %v97_v56  ;;  %180 = vst [vmem:[%s310_s1 + $0x70] sm:$0xff] %v97_v56  ;;  %v108_v63 = vsub.f32 0.0, %v101_v58  ;;  %v110_v0 = vsub.f32 0.0, %v98_v57 }
  0x25   :  { %173 = vst [vmem:[%s311_s2 + $0x50] sm:$0xff] %v98_v57  ;;  %174 = vst [vmem:[%s310_s1 + $0x58] sm:$0xff] %v101_v58  ;;  %v107_v1 = vsub.f32 0.0, %v102_v60  ;;  %v112_v2 = vsub.f32 0.0, %v93_v59 }
  0x26   :  { %170 = vst [vmem:[%s310_s1 + $0x48] sm:$0xff] %v93_v59  ;;  %175 = vst [vmem:[%s311_s2 + $0x58] sm:$0xff] %v102_v60  ;;  %v111_v3 = vsub.f32 0.0, %v94_v62 }
  0x27   :  { %176 = vst [vmem:[%s310_s1 + $0x60] sm:$0xff] %v106_v61  ;;  %171 = vst [vmem:[%s311_s2 + $0x48] sm:$0xff] %v94_v62  ;;  %v109_v4 = vsub.f32 0.0, %v107_v1 }
  0x28   :  { %178 = vst [vmem:[%s310_s1 + $0x68] sm:$0xff] %v108_v63  ;;  %181 = vst [vmem:[%s311_s2 + $0x70] sm:$0xff] %v110_v0  ;;  %v113_v5 = vsub.f32 0.0, %v111_v3 }
  0x29   :  { %182 = vst [vmem:[%s310_s1 + $0x78] sm:$0xff] %v112_v2  ;;  %179 = vst [vmem:[%s311_s2 + $0x68] sm:$0xff] %v109_v4 }
  0x2a   :  { %183 = vst [vmem:[%s311_s2 + $0x78] sm:$0xff] %v113_v5 }

</bundles_post_ra>
